<compile_context>
chip_gen: v5e
topology: v5e:2x2
jax: 0.10.0
libtpu: 0.0.40
codegen_flags: <defaults>
</compile_context>

<pallas_src>
import functools

import jax
import jax.numpy as jnp
from jax import lax
from jax.experimental import pallas as pl
from jax.experimental.pallas import tpu as pltpu


# ---------------------------------------------------------------------------
# Shared tile computation: partial conv, channels-major [C, T] f32
# ---------------------------------------------------------------------------
def _partial_conv_tile(w_ref, xp_ref, msum_ref):
    # W [C, K] bf16 @ patches [K, T] bf16 -> [C, T] f32 on the MXU.
    conv = jnp.dot(w_ref[...], xp_ref[0], preferred_element_type=jnp.float32)
    msum = msum_ref[0]                                   # [1, T] mask-window sums
    holes = msum == 0.0
    # Exact reciprocal (cheap in a mem-bound kernel; keeps BN stats close to torch).
    inv = jnp.where(holes, 0.0, 1.0 / jnp.where(holes, 1.0, msum))
    return conv * inv                                    # holes -> 0 (masked_fill_)


# ---------------------------------------------------------------------------
# Pass 1: per-tile BN partial sums / sums-of-squares (stats only, no big output)
# ---------------------------------------------------------------------------
def _pc_stats_kernel(w_ref, xp_ref, msum_ref, psum_ref, psq_ref):
    out = _partial_conv_tile(w_ref, xp_ref, msum_ref)            # [C, T]
    c = out.shape[0]
    psum_ref[...] = jnp.sum(out, axis=1, keepdims=True).reshape(1, 1, c, 1)
    psq_ref[...] = jnp.sum(out * out, axis=1, keepdims=True).reshape(1, 1, c, 1)


# ---------------------------------------------------------------------------
# Pass 2: recompute conv, apply normalization + BN affine + ReLU, write the
#         output directly in channels-major (N, C, Ho*Wo) layout.
# ---------------------------------------------------------------------------
def _pc_bn_relu_kernel(w_ref, scale_ref, shift_ref, xp_ref, msum_ref, out_ref):
    out = _partial_conv_tile(w_ref, xp_ref, msum_ref)            # [C, T]
    y = out * scale_ref[...] + shift_ref[...]                    # per-channel BN affine
    y = jnp.maximum(y, 0.0)                                      # ReLU
    c, t = y.shape
    out_ref[...] = y.reshape(1, c, t).astype(out_ref.dtype)


# ---------------------------------------------------------------------------
# Wrapper helpers
# ---------------------------------------------------------------------------
def _round_up(x, m):
    return (x + m - 1) // m * m


def _vmem_budget_bytes():
    # ~75% of per-core VMEM (v5e/v6e: 128 MiB -> 96 MiB, v7x: 64 MiB -> 48 MiB).
    try:
        cap = int(pltpu.get_tpu_info().vmem_capacity_bytes)
    except Exception:
        cap = 64 * 1024 * 1024
    return (cap * 3) // 4


def _pick_tile_hw(hw, k_dim, c_out, budget):
    # Double-buffered per-spatial-position bytes: patches (bf16) + msum (f32) + out (f32).
    per_row = 2 * (k_dim * 2 + 4 + c_out * 4)
    fixed = 2 * (c_out * k_dim * 2) + (2 << 20)      # resident weights + headroom
    max_rows = max((budget - fixed) // per_row, 128)
    tile = min(_round_up(hw, 128), 2048, (max_rows // 128) * 128)
    return max(int(tile), 128)


# ---------------------------------------------------------------------------
# PCDown forward
# ---------------------------------------------------------------------------
@functools.partial(jax.jit, static_argnames=("k", "s", "p"))
def pcdown_forward(x, mask, weight, gamma, beta, *, k=3, s=2, p=1):
    """PCDown forward.

    x, mask : [N, C_in, H, W]      (NCHW, like PyTorch)
    weight  : [C_out, C_in, k, k]  (conv_bias=False)
    gamma, beta : [C_out]          (BatchNorm2d affine)
    Returns (h, h_mask), each [N, C_out, H_out, W_out].
    """
    n, c_in, h, w = x.shape
    c_out = weight.shape[0]
    ho = (h + 2 * p - k) // s + 1
    wo = (w + 2 * p - k) // s + 1
    hw = ho * wo
    k_dim = c_in * k * k
    m_rows = n * hw

    # ---- tiling (chip/shape aware) ------------------------------------------
    budget = _vmem_budget_bytes()
    tile = _pick_tile_hw(hw, k_dim, c_out, budget)
    hwp = _round_up(hw, tile)
    num_t = hwp // tile

    # ---- wrapper prep: NCHW im2col of (x*mask), built directly in bf16 ------
    xm = (x * mask).astype(jnp.bfloat16)
    xm = jnp.pad(xm, ((0, 0), (0, 0), (p, p), (p, p)))
    cols = []
    for ky in range(k):
        for kx in range(k):
            cols.append(xm[:, :, ky:ky + s * ho:s, kx:kx + s * wo:s])
    patches = jnp.concatenate(cols, axis=1)              # [N, k*k*C_in, Ho, Wo] (ky,kx,c)
    patches = patches.reshape(n, k_dim, hw)
    patches = jnp.pad(patches, ((0, 0), (0, 0), (0, hwp - hw)))

    # mask_conv has an all-ones kernel -> every output channel equals the window
    # sum of the channel-summed mask.
    mc = jnp.pad(mask.sum(axis=1), ((0, 0), (p, p), (p, p)))   # [N, H+2p, W+2p]
    msum_sp = jnp.zeros((n, ho, wo), jnp.float32)
    for ky in range(k):
        for kx in range(k):
            msum_sp = msum_sp + mc[:, ky:ky + s * ho:s, kx:kx + s * wo:s]
    msum = msum_sp.reshape(n, 1, hw).astype(jnp.float32)
    msum = jnp.pad(msum, ((0, 0), (0, 0), (0, hwp - hw)))   # padded tail: msum==0 -> ignored

    # weight [C_out, C_in, k, k] -> [C_out, K] in (ky, kx, c) order (matches im2col)
    w_mat = weight.transpose(0, 2, 3, 1).reshape(c_out, k_dim).astype(jnp.bfloat16)

    cparams = pltpu.CompilerParams(
        dimension_semantics=("parallel", "parallel"),
        vmem_limit_bytes=int(min(budget, 112 * 1024 * 1024)),
    )

    # ---- pass 1: per-tile BN partial statistics ------------------------------
    psum, psq = pl.pallas_call(
        _pc_stats_kernel,
        grid=(n, num_t),
        in_specs=[
            pl.BlockSpec((c_out, k_dim), lambda b, t: (0, 0)),        # weights (resident)
            pl.BlockSpec((1, k_dim, tile), lambda b, t: (b, 0, t)),   # im2col patches
            pl.BlockSpec((1, 1, tile), lambda b, t: (b, 0, t)),       # mask-window sums
        ],
        out_specs=(
            pl.BlockSpec((1, 1, c_out, 1), lambda b, t: (b, t, 0, 0)),
            pl.BlockSpec((1, 1, c_out, 1), lambda b, t: (b, t, 0, 0)),
        ),
        out_shape=(
            jax.ShapeDtypeStruct((n, num_t, c_out, 1), jnp.float32),
            jax.ShapeDtypeStruct((n, num_t, c_out, 1), jnp.float32),
        ),
        compiler_params=cparams,
    )(w_mat, patches, msum)

    # ---- combine BN batch statistics (tiny arrays, plain XLA) ----------------
    eps = 1e-5
    inv_m = 1.0 / float(m_rows)
    mean = psum.sum(axis=(0, 1))[:, 0] * inv_m            # [C]
    ex2 = psq.sum(axis=(0, 1))[:, 0] * inv_m              # [C]
    var = jnp.maximum(ex2 - mean * mean, 0.0)             # biased variance (training BN)
    scale = gamma.astype(jnp.float32) * lax.rsqrt(var + eps)
    shift = beta.astype(jnp.float32) - mean * scale
    scale_col = scale.reshape(c_out, 1)
    shift_col = shift.reshape(c_out, 1)

    # ---- pass 2: recompute conv + normalize + BN + ReLU, channels-major out --
    y = pl.pallas_call(
        _pc_bn_relu_kernel,
        grid=(n, num_t),
        in_specs=[
            pl.BlockSpec((c_out, k_dim), lambda b, t: (0, 0)),        # weights (resident)
            pl.BlockSpec((c_out, 1), lambda b, t: (0, 0)),            # BN scale
            pl.BlockSpec((c_out, 1), lambda b, t: (0, 0)),            # BN shift
            pl.BlockSpec((1, k_dim, tile), lambda b, t: (b, 0, t)),   # im2col patches
            pl.BlockSpec((1, 1, tile), lambda b, t: (b, 0, t)),       # mask-window sums
        ],
        out_specs=pl.BlockSpec((1, c_out, tile), lambda b, t: (b, 0, t)),
        out_shape=jax.ShapeDtypeStruct((n, c_out, hwp), jnp.float32),
        compiler_params=cparams,
    )(w_mat, scale_col, shift_col, patches, msum)

    # ---- outputs: already channel-major; slice only if spatial padding exists
    h_out = y[:, :, :hw].reshape(n, c_out, ho, wo)
    # Updated mask depends only on the window sum.  Broadcast across channels to
    # match the PyTorch module's (N, C_out, Ho, Wo) return (consumers that only
    # need validity could take valid[:, None] instead and skip this HBM write).
    valid = (msum_sp > 0.0).astype(x.dtype)               # [N, Ho, Wo]
    h_mask = jnp.broadcast_to(valid[:, None, :, :], (n, c_out, ho, wo))
    return h_out, h_mask


# ---------------------------------------------------------------------------
# Pure-XLA reference (independent of the kernel's im2col path)
# ---------------------------------------------------------------------------
def _reference_pcdown(x, mask, weight, gamma, beta, k, s, p):
    dn = ("NCHW", "OIHW", "NCHW")
    conv = lax.conv_general_dilated(x * mask, weight, (s, s), ((p, p), (p, p)),
                                    dimension_numbers=dn)
    msum = lax.conv_general_dilated(mask, jnp.ones_like(weight), (s, s),
                                    ((p, p), (p, p)), dimension_numbers=dn)
    holes = msum == 0.0
    out = jnp.where(holes, 0.0, conv / jnp.where(holes, 1.0, msum))
    mean = out.mean(axis=(0, 2, 3), keepdims=True)
    var = out.var(axis=(0, 2, 3), keepdims=True)
    g = gamma.reshape(1, -1, 1, 1)
    b = beta.reshape(1, -1, 1, 1)
    y = jnp.maximum((out - mean) * lax.rsqrt(var + 1e-5) * g + b, 0.0)
    new_mask = jnp.where(holes, 0.0, 1.0)
    return y, new_mask


if __name__ == "__main__":
    key = jax.random.PRNGKey(0)
    k_x, k_m, k_w = jax.random.split(key, 3)

    N, C_IN, C_OUT, H, W = 2, 4, 8, 16, 16
    K, S, P = 3, 2, 1

    x = jax.random.normal(k_x, (N, C_IN, H, W), dtype=jnp.float32)
    # binary mask with holes
    mask = jax.random.bernoulli(k_m, p=0.7, shape=(N, C_IN, H, W)).astype(jnp.float32)

    # Deterministic parameter init (mirrors PartialConv / BatchNorm2d __init__):
    # input_conv weight: kaiming normal (fan_in = C_in*k*k); conv_bias=False.
    fan_in = C_IN * K * K
    weight = jax.random.normal(k_w, (C_OUT, C_IN, K, K), dtype=jnp.float32) * jnp.sqrt(2.0 / fan_in)
    gamma = jnp.ones((C_OUT,), dtype=jnp.float32)   # BN weight init
    beta = jnp.zeros((C_OUT,), dtype=jnp.float32)   # BN bias init

    h, h_mask = pcdown_forward(x, mask, weight, gamma, beta, k=K, s=S, p=P)
    jax.block_until_ready((h, h_mask))

    assert h.shape == (N, C_OUT, H // 2, W // 2)
    assert h_mask.shape == (N, C_OUT, H // 2, W // 2)

    # Lightweight correctness check vs an XLA reference (bf16 matmul -> loose tol).
    h_ref, m_ref = _reference_pcdown(x, mask, weight, gamma, beta, K, S, P)
    err = float(jnp.max(jnp.abs(h - h_ref)))
    assert err < 0.1, f"max abs err {err}"
    assert bool(jnp.all(h_mask == m_ref))

    print("KERNEL_OK")
</pallas_src>

<mosaic_0001>
module attributes {stable_mosaic.version = 11 : i64} {
  func.func @_pc_stats_kernel(%arg0: i32, %arg1: i32, %arg2: memref<8x36xbf16, #tpu.memory_space<vmem>>, %arg3: memref<1x36x128xbf16, #tpu.memory_space<vmem>>, %arg4: memref<1x1x128xf32, #tpu.memory_space<vmem>>, %arg5: memref<1x1x8x1xf32, #tpu.memory_space<vmem>>, %arg6: memref<1x1x8x1xf32, #tpu.memory_space<vmem>>) attributes {dimension_semantics = [#tpu.dimension_semantics<parallel>, #tpu.dimension_semantics<parallel>], iteration_bounds = array<i64: 2, 1>, scalar_prefetch = 0 : i64, scratch_operands = 0 : i64, tpu.core_type = #tpu.core_type<tc>, window_params = [{pipeline_mode = #tpu.pipeline_mode<synchronous>, transform_indices = @transform_0, window_bounds = array<i64: 8, 36>}, {transform_indices = @transform_1, window_bounds = array<i64: 1, 36, 128>}, {transform_indices = @transform_2, window_bounds = array<i64: 1, 1, 128>}, {transform_indices = @transform_3, window_bounds = array<i64: 1, 1, 8, 1>}, {transform_indices = @transform_4, window_bounds = array<i64: 1, 1, 8, 1>}]} {
    %c0 = arith.constant 0 : index
    %c0_0 = arith.constant 0 : index
    %0 = vector.load %arg2[%c0, %c0_0] : memref<8x36xbf16, #tpu.memory_space<vmem>>, vector<8x36xbf16>
    %c0_1 = arith.constant 0 : index
    %c0_2 = arith.constant 0 : index
    %c0_3 = arith.constant 0 : index
    %1 = vector.load %arg3[%c0_1, %c0_2, %c0_3] : memref<1x36x128xbf16, #tpu.memory_space<vmem>>, vector<1x36x128xbf16>
    %2 = vector.shape_cast %1 : vector<1x36x128xbf16> to vector<36x128xbf16>
    %cst = arith.constant dense<0.000000e+00> : vector<8x128xf32>
    %3 = tpu.matmul %0, %2, %cst {dimension_numbers = #tpu.dot_dimension_numbers<[1], [0], [0], [1], [0, 0, 1, 1], [], []>} : vector<8x36xbf16>, vector<36x128xbf16>, vector<8x128xf32> -> vector<8x128xf32>
    %c0_4 = arith.constant 0 : index
    %c0_5 = arith.constant 0 : index
    %c0_6 = arith.constant 0 : index
    %4 = vector.load %arg4[%c0_4, %c0_5, %c0_6] : memref<1x1x128xf32, #tpu.memory_space<vmem>>, vector<1x1x128xf32>
    %5 = vector.shape_cast %4 : vector<1x1x128xf32> to vector<1x128xf32>
    %cst_7 = arith.constant 0.000000e+00 : f32
    %6 = vector.broadcast %cst_7 : f32 to vector<1x128xf32>
    %7 = arith.cmpf oeq, %5, %6 : vector<1x128xf32>
    %cst_8 = arith.constant 1.000000e+00 : f32
    %8 = vector.broadcast %cst_8 : f32 to vector<1x128xf32>
    %9 = arith.select %7, %8, %5 : vector<1x128xi1>, vector<1x128xf32>
    %cst_9 = arith.constant 1.000000e+00 : f32
    %10 = vector.broadcast %cst_9 : f32 to vector<1x128xf32>
    %11 = arith.divf %10, %9 : vector<1x128xf32>
    %cst_10 = arith.constant 0.000000e+00 : f32
    %12 = vector.broadcast %cst_10 : f32 to vector<1x128xf32>
    %13 = arith.select %7, %12, %11 : vector<1x128xi1>, vector<1x128xf32>
    %14 = vector.broadcast %13 : vector<1x128xf32> to vector<8x128xf32>
    %15 = arith.mulf %3, %14 : vector<8x128xf32>
    %cst_11 = arith.constant dense<0.000000e+00> : vector<8xf32>
    %16 = vector.multi_reduction <add>, %15, %cst_11 [1] : vector<8x128xf32> to vector<8xf32>
    %17 = vector.shape_cast %16 : vector<8xf32> to vector<8x1xf32>
    %18 = vector.shape_cast %17 : vector<8x1xf32> to vector<1x1x8x1xf32>
    %c0_12 = arith.constant 0 : index
    %c0_13 = arith.constant 0 : index
    %c0_14 = arith.constant 0 : index
    %c0_15 = arith.constant 0 : index
    %19 = vector.load %arg5[%c0_12, %c0_13, %c0_14, %c0_15] : memref<1x1x8x1xf32, #tpu.memory_space<vmem>>, vector<1x1x8x1xf32>
    tpu.vector_store %arg5[%c0_12, %c0_13, %c0_14, %c0_15], %18 {strides = array<i32>} : memref<1x1x8x1xf32, #tpu.memory_space<vmem>>, vector<1x1x8x1xf32>,
    %20 = arith.mulf %15, %15 : vector<8x128xf32>
    %cst_16 = arith.constant dense<0.000000e+00> : vector<8xf32>
    %21 = vector.multi_reduction <add>, %20, %cst_16 [1] : vector<8x128xf32> to vector<8xf32>
    %22 = vector.shape_cast %21 : vector<8xf32> to vector<8x1xf32>
    %23 = vector.shape_cast %22 : vector<8x1xf32> to vector<1x1x8x1xf32>
    %c0_17 = arith.constant 0 : index
    %c0_18 = arith.constant 0 : index
    %c0_19 = arith.constant 0 : index
    %c0_20 = arith.constant 0 : index
    %24 = vector.load %arg6[%c0_17, %c0_18, %c0_19, %c0_20] : memref<1x1x8x1xf32, #tpu.memory_space<vmem>>, vector<1x1x8x1xf32>
    tpu.vector_store %arg6[%c0_17, %c0_18, %c0_19, %c0_20], %23 {strides = array<i32>} : memref<1x1x8x1xf32, #tpu.memory_space<vmem>>, vector<1x1x8x1xf32>,
    return
  }
  func.func @transform_0(%arg0: i32, %arg1: i32) -> (i32, i32) {
    %c0_i32 = arith.constant 0 : i32
    %c0_i32_0 = arith.constant 0 : i32
    %c0_i32_1 = arith.constant 0 : i32
    return %c0_i32, %c0_i32_0 : i32, i32
  }
  func.func @transform_1(%arg0: i32, %arg1: i32) -> (i32, i32, i32) {
    %c0_i32 = arith.constant 0 : i32
    %c0_i32_0 = arith.constant 0 : i32
    return %arg0, %c0_i32, %arg1 : i32, i32, i32
  }
  func.func @transform_2(%arg0: i32, %arg1: i32) -> (i32, i32, i32) {
    %c0_i32 = arith.constant 0 : i32
    %c0_i32_0 = arith.constant 0 : i32
    return %arg0, %c0_i32, %arg1 : i32, i32, i32
  }
  func.func @transform_3(%arg0: i32, %arg1: i32) -> (i32, i32, i32, i32) {
    %c0_i32 = arith.constant 0 : i32
    %c0_i32_0 = arith.constant 0 : i32
    %c0_i32_1 = arith.constant 0 : i32
    return %arg0, %arg1, %c0_i32, %c0_i32_0 : i32, i32, i32, i32
  }
  func.func @transform_4(%arg0: i32, %arg1: i32) -> (i32, i32, i32, i32) {
    %c0_i32 = arith.constant 0 : i32
    %c0_i32_0 = arith.constant 0 : i32
    %c0_i32_1 = arith.constant 0 : i32
    return %arg0, %arg1, %c0_i32, %c0_i32_0 : i32, i32, i32, i32
  }
}

module attributes {stable_mosaic.version = 11 : i64} {
  func.func @_pc_bn_relu_kernel(%arg0: i32, %arg1: i32, %arg2: memref<8x36xbf16, #tpu.memory_space<vmem>>, %arg3: memref<8x1xf32, #tpu.memory_space<vmem>>, %arg4: memref<8x1xf32, #tpu.memory_space<vmem>>, %arg5: memref<1x36x128xbf16, #tpu.memory_space<vmem>>, %arg6: memref<1x1x128xf32, #tpu.memory_space<vmem>>, %arg7: memref<1x8x128xf32, #tpu.memory_space<vmem>>) attributes {dimension_semantics = [#tpu.dimension_semantics<parallel>, #tpu.dimension_semantics<parallel>], iteration_bounds = array<i64: 2, 1>, scalar_prefetch = 0 : i64, scratch_operands = 0 : i64, tpu.core_type = #tpu.core_type<tc>, window_params = [{pipeline_mode = #tpu.pipeline_mode<synchronous>, transform_indices = @transform_0, window_bounds = array<i64: 8, 36>}, {pipeline_mode = #tpu.pipeline_mode<synchronous>, transform_indices = @transform_1, window_bounds = array<i64: 8, 1>}, {pipeline_mode = #tpu.pipeline_mode<synchronous>, transform_indices = @transform_2, window_bounds = array<i64: 8, 1>}, {transform_indices = @transform_3, window_bounds = array<i64: 1, 36, 128>}, {transform_indices = @transform_4, window_bounds = array<i64: 1, 1, 128>}, {transform_indices = @transform_5, window_bounds = array<i64: 1, 8, 128>}]} {
    %c0 = arith.constant 0 : index
    %c0_0 = arith.constant 0 : index
    %0 = vector.load %arg2[%c0, %c0_0] : memref<8x36xbf16, #tpu.memory_space<vmem>>, vector<8x36xbf16>
    %c0_1 = arith.constant 0 : index
    %c0_2 = arith.constant 0 : index
    %c0_3 = arith.constant 0 : index
    %1 = vector.load %arg5[%c0_1, %c0_2, %c0_3] : memref<1x36x128xbf16, #tpu.memory_space<vmem>>, vector<1x36x128xbf16>
    %2 = vector.shape_cast %1 : vector<1x36x128xbf16> to vector<36x128xbf16>
    %cst = arith.constant dense<0.000000e+00> : vector<8x128xf32>
    %3 = tpu.matmul %0, %2, %cst {dimension_numbers = #tpu.dot_dimension_numbers<[1], [0], [0], [1], [0, 0, 1, 1], [], []>} : vector<8x36xbf16>, vector<36x128xbf16>, vector<8x128xf32> -> vector<8x128xf32>
    %c0_4 = arith.constant 0 : index
    %c0_5 = arith.constant 0 : index
    %c0_6 = arith.constant 0 : index
    %4 = vector.load %arg6[%c0_4, %c0_5, %c0_6] : memref<1x1x128xf32, #tpu.memory_space<vmem>>, vector<1x1x128xf32>
    %5 = vector.shape_cast %4 : vector<1x1x128xf32> to vector<1x128xf32>
    %cst_7 = arith.constant 0.000000e+00 : f32
    %6 = vector.broadcast %cst_7 : f32 to vector<1x128xf32>
    %7 = arith.cmpf oeq, %5, %6 : vector<1x128xf32>
    %cst_8 = arith.constant 1.000000e+00 : f32
    %8 = vector.broadcast %cst_8 : f32 to vector<1x128xf32>
    %9 = arith.select %7, %8, %5 : vector<1x128xi1>, vector<1x128xf32>
    %cst_9 = arith.constant 1.000000e+00 : f32
    %10 = vector.broadcast %cst_9 : f32 to vector<1x128xf32>
    %11 = arith.divf %10, %9 : vector<1x128xf32>
    %cst_10 = arith.constant 0.000000e+00 : f32
    %12 = vector.broadcast %cst_10 : f32 to vector<1x128xf32>
    %13 = arith.select %7, %12, %11 : vector<1x128xi1>, vector<1x128xf32>
    %14 = vector.broadcast %13 : vector<1x128xf32> to vector<8x128xf32>
    %15 = arith.mulf %3, %14 : vector<8x128xf32>
    %c0_11 = arith.constant 0 : index
    %c0_12 = arith.constant 0 : index
    %16 = vector.load %arg3[%c0_11, %c0_12] : memref<8x1xf32, #tpu.memory_space<vmem>>, vector<8x1xf32>
    %17 = vector.broadcast %16 : vector<8x1xf32> to vector<8x128xf32>
    %18 = arith.mulf %15, %17 : vector<8x128xf32>
    %c0_13 = arith.constant 0 : index
    %c0_14 = arith.constant 0 : index
    %19 = vector.load %arg4[%c0_13, %c0_14] : memref<8x1xf32, #tpu.memory_space<vmem>>, vector<8x1xf32>
    %20 = vector.broadcast %19 : vector<8x1xf32> to vector<8x128xf32>
    %21 = arith.addf %18, %20 : vector<8x128xf32>
    %cst_15 = arith.constant 0.000000e+00 : f32
    %22 = vector.broadcast %cst_15 : f32 to vector<8x128xf32>
    %23 = arith.maximumf %21, %22 : vector<8x128xf32>
    %24 = vector.shape_cast %23 : vector<8x128xf32> to vector<1x8x128xf32>
    %c0_16 = arith.constant 0 : index
    %c0_17 = arith.constant 0 : index
    %c0_18 = arith.constant 0 : index
    %25 = vector.load %arg7[%c0_16, %c0_17, %c0_18] : memref<1x8x128xf32, #tpu.memory_space<vmem>>, vector<1x8x128xf32>
    tpu.vector_store %arg7[%c0_16, %c0_17, %c0_18], %24 {strides = array<i32>} : memref<1x8x128xf32, #tpu.memory_space<vmem>>, vector<1x8x128xf32>,
    return
  }
  func.func @transform_0(%arg0: i32, %arg1: i32) -> (i32, i32) {
    %c0_i32 = arith.constant 0 : i32
    %c0_i32_0 = arith.constant 0 : i32
    %c0_i32_1 = arith.constant 0 : i32
    return %c0_i32, %c0_i32_0 : i32, i32
  }
  func.func @transform_1(%arg0: i32, %arg1: i32) -> (i32, i32) {
    %c0_i32 = arith.constant 0 : i32
    %c0_i32_0 = arith.constant 0 : i32
    %c0_i32_1 = arith.constant 0 : i32
    return %c0_i32, %c0_i32_0 : i32, i32
  }
  func.func @transform_2(%arg0: i32, %arg1: i32) -> (i32, i32) {
    %c0_i32 = arith.constant 0 : i32
    %c0_i32_0 = arith.constant 0 : i32
    %c0_i32_1 = arith.constant 0 : i32
    return %c0_i32, %c0_i32_0 : i32, i32
  }
  func.func @transform_3(%arg0: i32, %arg1: i32) -> (i32, i32, i32) {
    %c0_i32 = arith.constant 0 : i32
    %c0_i32_0 = arith.constant 0 : i32
    return %arg0, %c0_i32, %arg1 : i32, i32, i32
  }
  func.func @transform_4(%arg0: i32, %arg1: i32) -> (i32, i32, i32) {
    %c0_i32 = arith.constant 0 : i32
    %c0_i32_0 = arith.constant 0 : i32
    return %arg0, %c0_i32, %arg1 : i32, i32, i32
  }
  func.func @transform_5(%arg0: i32, %arg1: i32) -> (i32, i32, i32) {
    %c0_i32 = arith.constant 0 : i32
    %c0_i32_0 = arith.constant 0 : i32
    return %arg0, %c0_i32, %arg1 : i32, i32, i32
  }
}

</mosaic_0001>

<bundles_post_ra>
// kernel: pcdown_forward.2
= control target key start
LH: loop header
LB: loop body
LE: loop exit
PB: predicated region body
PF: predicated region fallthrough
CT: control target
= control target key end

     0   :  { %s572_s15 = smov 0   ;;  %s574_s16 = smov 0   ;;  %s621_s0 = inlined_call_operand.vmem [shape: bf16[8,36], index: 0, kind: input, shape index: {}]   ;;  %s622_s1 = inlined_call_operand.vmem [shape: bf16[2,36,128], index: 1, kind: input, shape index: {}]   ;;  %s623_s2 = inlined_call_operand.vmem [shape: f32[2,1,128], index: 2, kind: input, shape index: {}]   ;;  %s624_s3 = inlined_call_operand.vmem [shape: f32[2,1,8,1], index: 3, kind: output, shape index: {0}]   ;;  %s625_s4 = inlined_call_operand.vmem [shape: f32[2,1,8,1], index: 4, kind: output, shape index: {1}]  }
   0x1   :  { %s576_s17 = smov 0  }
   0x2 LB: > { %s27_s18 = sadd.s32 1, %s541_s16  ;;  %p479_p0 = scmp.ge.s32.totalorder %s545_s17, 1  ;;  %s545_s17 = sphi %s576_s17, %s15_s17   ;;  %s541_s16 = sphi %s574_s16, %s627_s16   ;;  %s537_s15 = sphi %s572_s15, %s626_s15  }
   0x3   : > { %p29_p1 = scmp.ge.s32.totalorder %s27_s18, 2  ;;  %p199_p2 = scmp.lt.s32.totalorder %s545_s17, 3 }
   0x5   : > { %s629_s18 = smov (%p29_p1, %s27_s18), 0  ;;  %p200_p3 = pnand %p479_p0, %p199_p2 }
   0x6   : > { %p243_p4 = scmp.lt.s32.totalorder (!%p200_p3), %s537_s15, 1 }
   0x7   : > { %203 = sbr.rel (%p200_p3) target bundleno = 286 (0x11e), region = 32 }
   0xc   : > { %s631_s15 = smov (!%p243_p4, %s537_s15), 1  ;;  %vm297_vm0 = vcmask 1041408   ;;  %v272_v6 = vld [vmem:[%s621_s0] sm:$0xf]  ;;  %vm293_vm1 = vcmask 293888   ;;  %vm339_vm7 = vcmask 7168  }
   0xd   : > { %s496_s19 = smul.u32 20, %s631_s15  ;;  %s256_s27 = scalar_lea.vmem %s623_s2, %s631_s15 }
   0xe   : > { %v314_v7 = vld [vmem:[%s256_s27] sm:$0x1]  ;;  %s481_s28 = sshll.u32 %s631_s15, 3 }
   0xf   : > { %s250_s22 = scalar_lea.vmem %s622_s1, %s496_s19  ;;  %vm315_vm2 = vcmp.eq.f32.partialorder %v314_v7, 0.0  ;;  %s263_s5 = scalar_lea.vmem %s624_s3, %s481_s28 }
  0x10   : > { %v277_v0 = vld [vmem:[%s250_s22 + $0x10] sm:$0x3]  ;;  %v495_v4 = vld [vmem:[%s250_s22 + $0x8] sm:$0xff]  ;;  %v494_v5 = vld [vmem:[%s250_s22] sm:$0xff]  ;;  %v316_v8 = vsel %vm315_vm2, 1.0, %v314_v7  ;;  %s270_s8 = scalar_lea.vmem %s625_s4, %s481_s28 }
  0x11   : > { %v287_v1 = vunpack.c.l.b16 %v277_v0  ;;  %521 = vrcp.f32 %v316_v8  ;;  %vm322_vm3 = vweird.f32 %v316_v8  ;;  %v328_v13 = vand.u32 2147483648, %v316_v8 }
  0x12   : > { %v326_v15 = vand.u32 2147483647, %v316_v8 }
  0x13   : > { %v290_v2 = vpack.c.b16 %v287_v1, %v287_v1  ;;  %v329_v16 = vor.u32 1.1754944e-38, %v328_v13 }
  0x14   : > { %vm327_vm6 = vcmp.eq.f32.partialorder %v326_v15, 8.507059e+37 }
  0x15   : > { %v299_v3 = vsel %vm297_vm0, %v290_v2, 0 }
  0x16   : > { %306 = vmatpush.bf16.msra.mxu0 %v299_v3 }
  0x17   : > { %v522_v9 = vpop.eup %521 }
  0x18   : > { %v318_v10 = vmul.f32 %v522_v9, %v316_v8  ;;  %vm323_vm4 = vweird.f32 %v522_v9 }
  0x19   : > { %vm324_vm5 = vmor %vm322_vm3, %vm323_vm4 }
  0x1a   : > { %307 = vmatpush.bf16.msra.mxu0 %v495_v4  ;;  %v319_v11 = vsub.f32 1.0, %v318_v10 }
  0x1c   : > { %v320_v12 = vmul.f32 %v522_v9, %v319_v11 }
  0x1e   : > { %308 = vmatpush.bf16.msra.mxu0 %v494_v5  ;;  %v321_v14 = vadd.f32 %v522_v9, %v320_v12 }
  0x20   : > { %v325_v17 = vsel %vm324_vm5, %v522_v9, %v321_v14 }
  0x21   : > { %491 = vmatmul.msk.bf16.vlgmr.msra.gmra.mxu0 %vm293_vm1, %v272_v6  ;;  %v330_v18 = vsel %vm327_vm6, %v329_v16, %v325_v17 }
  0x22   : > { %v332_v19 = vsel %vm315_vm2, 0.0, %v330_v18 }
  0x23   : > { %v334_v20 = vperm.slane %v332_v19, 0 }
  0x9e   : > { %v310_v21 = vpop.f32.mrf.mxu0 }
  0x9f   : > { %v336_v22 = vmul.f32 %v334_v20, %v310_v21 }
  0xa1   : > { %337 = vadd.xlane.f32.xlu0 %v336_v22  ;;  %v341_v24 = vmul.f32 %v336_v22, %v336_v22 }
  0xa6   : > { %v312_v23 = vpop.f32.mrf.mxu0 }
  0xa9   : > { %342 = vadd.xlane.f32.xlu0 %v341_v24 }
 0x114   : > { %v338_v25 = vpop.xlane.xlu0 %337 }
 0x115   : > { %340 = vst.msk [vmem:[%s263_s5] sm:$0xff] %vm339_vm7, %v338_v25 }
 0x11c   : > { %v343_v26 = vpop.xlane.xlu0 %342 }
 0x11d   : > { %344 = vst.msk [vmem:[%s270_s8] sm:$0xff] %vm339_vm7, %v343_v26 }
 0x11e PF: > { %s15_s17 = sadd.s32 1, %s545_s17   ;;  %s626_s15 = smov %s541_s16 }
 0x11f   : > { %p12_p5 = scmp.ge.s32.totalorder %s15_s17, 4   ;;  %s627_s16 = smov %s629_s18 }
 0x121   :  { %14 = sbr.rel (!%p12_p5) target bundleno = 2 (0x2), region = 77 }

// kernel: pcdown_forward.3
= control target key start
LH: loop header
LB: loop body
LE: loop exit
PB: predicated region body
PF: predicated region fallthrough
CT: control target
= control target key end

     0   :  { %s554_s18 = smov 0   ;;  %s556_s19 = smov 0   ;;  %s606_s0 = inlined_call_operand.vmem [shape: bf16[8,36], index: 0, kind: input, shape index: {}]   ;;  %s607_s1 = inlined_call_operand.vmem [shape: f32[8,1], index: 1, kind: input, shape index: {}]   ;;  %s608_s2 = inlined_call_operand.vmem [shape: f32[8,1], index: 2, kind: input, shape index: {}]   ;;  %s609_s3 = inlined_call_operand.vmem [shape: bf16[2,36,128], index: 3, kind: input, shape index: {}]   ;;  %s610_s4 = inlined_call_operand.vmem [shape: f32[2,1,128], index: 4, kind: input, shape index: {}]   ;;  %s611_s5 = inlined_call_operand.vmem [shape: f32[2,8,128], index: 5, kind: output, shape index: {}]  }
   0x1   :  { %s558_s20 = smov 0  }
   0x2 LB: > { %s27_s21 = sadd.s32 1, %s517_s19  ;;  %p454_p0 = scmp.ge.s32.totalorder %s521_s20, 1  ;;  %s521_s20 = sphi %s558_s20, %s15_s20   ;;  %s517_s19 = sphi %s556_s19, %s613_s19   ;;  %s513_s18 = sphi %s554_s18, %s612_s18  }
   0x3   : > { %p29_p1 = scmp.ge.s32.totalorder %s27_s21, 2  ;;  %p219_p2 = scmp.lt.s32.totalorder %s521_s20, 3 }
   0x5   : > { %s615_s21 = smov (%p29_p1, %s27_s21), 0  ;;  %p220_p3 = pnand %p454_p0, %p219_p2 }
   0x6   : > { %p258_p4 = scmp.lt.s32.totalorder (!%p220_p3), %s513_s18, 1 }
   0x7   : > { %223 = sbr.rel (%p220_p3) target bundleno = 168 (0xa8), region = 40 }
   0xc   : > { %v345_v0 = vld [vmem:[%s607_s1] sm:$0xff]  ;;  %v523_v1 = vmov 0   ;;  %s617_s18 = smov (!%p258_p4, %s513_s18), 1  ;;  %vm305_vm0 = vcmask 1041408   ;;  %vm301_vm1 = vcmask 293888  }
   0xd   : > { %496 = vset.pattern.permute.xlu0 %v523_v1  ;;  %s470_s24 = smul.u32 20, %s617_s18  ;;  %v352_v3 = vld [vmem:[%s608_s2] sm:$0xff]  ;;  %s271_s9 = scalar_lea.vmem %s610_s4, %s617_s18 }
   0xe   : > { %348 = vperm.xlu0 %496, %v345_v0   ;;  %v280_v9 = vld [vmem:[%s606_s0] sm:$0xf]  ;;  %s456_s10 = sshll.u32 %s617_s18, 3 }
   0xf   : > { %s265_s27 = scalar_lea.vmem %s609_s3, %s470_s24  ;;  %v322_v10 = vld [vmem:[%s271_s9] sm:$0x1]  ;;  %s278_s13 = scalar_lea.vmem %s611_s5, %s456_s10 }
  0x10   : > { %v285_v2 = vld [vmem:[%s265_s27 + $0x10] sm:$0x3]  ;;  %v469_v7 = vld [vmem:[%s265_s27 + $0x8] sm:$0xff]  ;;  %v468_v8 = vld [vmem:[%s265_s27] sm:$0xff]  ;;  %vm323_vm2 = vcmp.eq.f32.partialorder %v322_v10, 0.0 }
  0x11   : > { %v295_v4 = vunpack.c.l.b16 %v285_v2  ;;  %v324_v11 = vsel %vm323_vm2, 1.0, %v322_v10 }
  0x12   : > { %497 = vrcp.f32 %v324_v11  ;;  %vm330_vm3 = vweird.f32 %v324_v11  ;;  %v336_v16 = vand.u32 2147483648, %v324_v11  ;;  %v334_v18 = vand.u32 2147483647, %v324_v11 }
  0x13   : > { %v298_v5 = vpack.c.b16 %v295_v4, %v295_v4 }
  0x14   : > { %v337_v19 = vor.u32 1.1754944e-38, %v336_v16  ;;  %vm335_vm6 = vcmp.eq.f32.partialorder %v334_v18, 8.507059e+37 }
  0x15   : > { %v307_v6 = vsel %vm305_vm0, %v298_v5, 0 }
  0x16   : > { %355 = vperm.xlu0 %496, %v352_v3   ;;  %314 = vmatpush.bf16.msra.mxu0 %v307_v6 }
  0x18   : > { %v498_v12 = vpop.eup %497 }
  0x19   : > { %v326_v13 = vmul.f32 %v498_v12, %v324_v11  ;;  %vm331_vm4 = vweird.f32 %v498_v12 }
  0x1a   : > { %315 = vmatpush.bf16.msra.mxu0 %v469_v7  ;;  %vm332_vm5 = vmor %vm330_vm3, %vm331_vm4 }
  0x1b   : > { %v327_v14 = vsub.f32 1.0, %v326_v13 }
  0x1d   : > { %v328_v15 = vmul.f32 %v498_v12, %v327_v14 }
  0x1e   : > { %316 = vmatpush.bf16.msra.mxu0 %v468_v8 }
  0x1f   : > { %v329_v17 = vadd.f32 %v498_v12, %v328_v15 }
  0x21   : > { %465 = vmatmul.msk.bf16.vlgmr.msra.gmra.mxu0 %vm301_vm1, %v280_v9  ;;  %v333_v20 = vsel %vm332_vm5, %v498_v12, %v329_v17 }
  0x22   : > { %v338_v21 = vsel %vm335_vm6, %v337_v19, %v333_v20 }
  0x23   : > { %v340_v23 = vsel %vm323_vm2, 0.0, %v338_v21 }
  0x24   : > { %v342_v24 = vperm.slane %v340_v23, 0 }
  0x80   : > { %v349_v22 = vpop.permute.xlu0 %348 }
  0x88   : > { %v356_v28 = vpop.permute.xlu0 %355 }
  0x9e   : > { %v318_v25 = vpop.f32.mrf.mxu0 }
  0x9f   : > { %v344_v26 = vmul.f32 %v342_v24, %v318_v25 }
  0xa1   : > { %v351_v27 = vmul.f32 %v349_v22, %v344_v26 }
  0xa3   : > { %v358_v29 = vadd.f32 %v356_v28, %v351_v27 }
  0xa5   : > { %v359_v30 = vmax.f32 %v358_v29, 0.0 }
  0xa6   : > { %v320_v31 = vpop.f32.mrf.mxu0 }
  0xa7   : > { %360 = vst [vmem:[%s278_s13] sm:$0xff] %v359_v30 }
  0xa8 PF: > { %s15_s20 = sadd.s32 1, %s521_s20   ;;  %s612_s18 = smov %s517_s19 }
  0xa9   : > { %p12_p5 = scmp.ge.s32.totalorder %s15_s20, 4   ;;  %s613_s19 = smov %s615_s21 }
  0xab   :  { %14 = sbr.rel (!%p12_p5) target bundleno = 2 (0x2), region = 73 }

</bundles_post_ra>
